<compile_context>
chip_gen: v7x
topology: tpu7x:2x2x1
jax: 0.10.0
libtpu: 0.0.40
codegen_flags: <defaults>
</compile_context>

<pallas_src>
import functools
import math

import jax
import jax.numpy as jnp
from jax.experimental import pallas as pl
from jax.experimental.pallas import tpu as pltpu


def _round_up(v, m):
    return ((v + m - 1) // m) * m


# --------------------------------------------------------------------------
# Projection kernel: support = x @ W        (row-tiled, bf16 in, bf16 out)
# --------------------------------------------------------------------------
def _project_kernel(x_ref, w_ref, o_ref):
    o_ref[...] = jnp.dot(
        x_ref[...], w_ref[...], preferred_element_type=jnp.float32
    ).astype(o_ref.dtype)


def _project(x, w, *, tm):
    n_pad, k_pad = x.shape
    f_pad = w.shape[1]
    flops = 2 * n_pad * k_pad * f_pad
    bytes_accessed = (
        x.size * x.dtype.itemsize + w.size * w.dtype.itemsize + n_pad * f_pad * 2
    )
    return pl.pallas_call(
        _project_kernel,
        out_shape=jax.ShapeDtypeStruct((n_pad, f_pad), jnp.bfloat16),
        grid_spec=pltpu.PrefetchScalarGridSpec(
            num_scalar_prefetch=0,
            grid=(n_pad // tm,),
            in_specs=[
                pl.BlockSpec((tm, k_pad), lambda i: (i, 0)),
                pl.BlockSpec((k_pad, f_pad), lambda i: (0, 0)),
            ],
            out_specs=pl.BlockSpec((tm, f_pad), lambda i: (i, 0)),
        ),
        compiler_params=pltpu.CompilerParams(
            dimension_semantics=("parallel",),
            vmem_limit_bytes=64 << 20,
        ),
        cost_estimate=pl.CostEstimate(
            flops=flops, transcendentals=0, bytes_accessed=bytes_accessed
        ),
    )(x, w)


# --------------------------------------------------------------------------
# Aggregation kernel: out = act(adj @ support + bias)
#   grid = (row tiles, k tiles); f32 scratch accumulator, finalize on last k.
#   act is "relu" (layer 1) or "log_softmax" over the valid class columns.
# --------------------------------------------------------------------------
def _aggregate_kernel(adj_ref, s_ref, b_ref, o_ref, acc_ref, *, activation,
                      valid_cols):
    k = pl.program_id(1)

    @pl.when(k == 0)
    def _():
        acc_ref[...] = jnp.zeros_like(acc_ref)

    acc_ref[...] += jnp.dot(
        adj_ref[...], s_ref[...], preferred_element_type=jnp.float32
    )

    @pl.when(k == pl.num_programs(1) - 1)
    def _():
        z = acc_ref[...] + b_ref[...]
        if activation == "relu":
            z = jnp.maximum(z, 0.0)
        elif activation == "log_softmax":
            # Mask padded class columns before the (f32) log_softmax.
            col = jax.lax.broadcasted_iota(jnp.int32, z.shape, 1)
            z = jnp.where(col < valid_cols, z, -jnp.inf)
            m = jnp.max(z, axis=1, keepdims=True)
            s = z - m
            lse = jnp.log(jnp.sum(jnp.exp(s), axis=1, keepdims=True))
            z = s - lse
        o_ref[...] = z.astype(o_ref.dtype)


def _aggregate(adj, support, bias, *, tm, tk, activation, valid_cols, out_dtype):
    n_pad = adj.shape[0]
    f_pad = support.shape[1]
    kernel = functools.partial(
        _aggregate_kernel, activation=activation, valid_cols=valid_cols
    )
    flops = 2 * n_pad * n_pad * f_pad
    transcendentals = n_pad * f_pad if activation == "log_softmax" else 0
    bytes_accessed = (
        adj.size * adj.dtype.itemsize
        + support.size * support.dtype.itemsize * (n_pad // tm)
        + n_pad * f_pad * jnp.dtype(out_dtype).itemsize
    )
    return pl.pallas_call(
        kernel,
        out_shape=jax.ShapeDtypeStruct((n_pad, f_pad), out_dtype),
        grid_spec=pltpu.PrefetchScalarGridSpec(
            num_scalar_prefetch=0,
            grid=(n_pad // tm, n_pad // tk),
            in_specs=[
                pl.BlockSpec((tm, tk), lambda i, k: (i, k)),
                pl.BlockSpec((tk, f_pad), lambda i, k: (k, 0)),
                pl.BlockSpec((1, f_pad), lambda i, k: (0, 0)),
            ],
            # Same block index across k -> resident output tile per row tile.
            out_specs=pl.BlockSpec((tm, f_pad), lambda i, k: (i, 0)),
            scratch_shapes=[pltpu.VMEM((tm, f_pad), jnp.float32)],
        ),
        compiler_params=pltpu.CompilerParams(
            dimension_semantics=("parallel", "arbitrary"),
            vmem_limit_bytes=64 << 20,
        ),
        cost_estimate=pl.CostEstimate(
            flops=flops,
            transcendentals=transcendentals,
            bytes_accessed=bytes_accessed,
        ),
    )(adj, support, bias)


# --------------------------------------------------------------------------
# Full GCN forward: log_softmax(adj @ relu(adj @ (x @ W1) + b1) @ W2 + b2)
# --------------------------------------------------------------------------
def gcn_forward(x, adj, w1, b1, w2, b2, *, tm=None, tk=None):
    N, nfeat = x.shape
    nhid = w1.shape[1]
    nclass = w2.shape[1]

    lane = 128
    if tm is None:
        tm = 256 if N > 128 else 128      # 256-multiples on v6e/v7x-sized graphs
    if tk is None:
        tk = tm
    n_pad = _round_up(N, max(tm, tk))
    nfeat_p = _round_up(nfeat, lane)
    nhid_p = _round_up(nhid, lane)
    nclass_p = _round_up(nclass, lane)

    # Zero-pad and cast the matmul operands to bf16 (f32 accumulation inside).
    x_p = jnp.zeros((n_pad, nfeat_p), jnp.bfloat16).at[:N, :nfeat].set(
        x.astype(jnp.bfloat16))
    adj_p = jnp.zeros((n_pad, n_pad), jnp.bfloat16).at[:N, :N].set(
        adj.astype(jnp.bfloat16))
    w1_p = jnp.zeros((nfeat_p, nhid_p), jnp.bfloat16).at[:nfeat, :nhid].set(
        w1.astype(jnp.bfloat16))
    w2_p = jnp.zeros((nhid_p, nclass_p), jnp.bfloat16).at[:nhid, :nclass].set(
        w2.astype(jnp.bfloat16))
    b1_p = jnp.zeros((1, nhid_p), jnp.float32).at[:, :nhid].set(
        b1.reshape(1, -1).astype(jnp.float32))
    b2_p = jnp.zeros((1, nclass_p), jnp.float32).at[:, :nclass].set(
        b2.reshape(1, -1).astype(jnp.float32))

    # Layer 1: h = relu(adj @ (x @ W1) + b1)
    support1 = _project(x_p, w1_p, tm=tm)
    h = _aggregate(adj_p, support1, b1_p, tm=tm, tk=tk,
                   activation="relu", valid_cols=nhid, out_dtype=jnp.bfloat16)

    # TODO(synk): F.dropout(training=True) would need a pltpu.prng_seed +
    # prng_random_bits mask; identity here (matches eval-mode dropout).

    # Layer 2 + log_softmax over classes.
    support2 = _project(h, w2_p, tm=tm)
    out_p = _aggregate(adj_p, support2, b2_p, tm=tm, tk=tk,
                       activation="log_softmax", valid_cols=nclass,
                       out_dtype=jnp.float32)
    return out_p[:N, :nclass]


def init_gc_params(key, in_features, out_features):
    """Matches GraphConvolution.reset_parameters: U(-stdv, stdv), stdv=1/sqrt(out)."""
    stdv = 1.0 / math.sqrt(out_features)
    kw, kb = jax.random.split(key)
    w = jax.random.uniform(kw, (in_features, out_features), jnp.float32, -stdv, stdv)
    b = jax.random.uniform(kb, (out_features,), jnp.float32, -stdv, stdv)
    return w, b


if __name__ == "__main__":
    # Small shapes consistent with the module: N nodes, nfeat -> nhid -> nclass.
    N, nfeat, nhid, nclass = 8, 16, 32, 8

    key = jax.random.PRNGKey(0)
    kx, kadj, k1, k2 = jax.random.split(key, 4)

    x = jax.random.normal(kx, (N, nfeat), jnp.float32)
    # Symmetric row-normalized dense adjacency (typical GCN preprocessing).
    a = jax.random.uniform(kadj, (N, N), jnp.float32)
    a = (a + a.T) * 0.5 + jnp.eye(N, dtype=jnp.float32)
    adj = a / jnp.sum(a, axis=1, keepdims=True)

    w1, b1 = init_gc_params(k1, nfeat, nhid)
    w2, b2 = init_gc_params(k2, nhid, nclass)

    out = jax.jit(gcn_forward)(x, adj, w1, b1, w2, b2)
    out = jax.block_until_ready(out)

    # bf16-aware pure-JAX reference (f32 accumulation), matching kernel dtypes.
    to_bf = lambda t: t.astype(jnp.bfloat16).astype(jnp.float32)
    xb, adjb, w1b, w2b = to_bf(x), to_bf(adj), to_bf(w1), to_bf(w2)
    s1 = to_bf(xb @ w1b)
    h_ref = to_bf(jnp.maximum(adjb @ s1 + b1.reshape(1, -1), 0.0))
    s2 = to_bf(h_ref @ w2b)
    z_ref = adjb @ s2 + b2.reshape(1, -1)
    ref = jax.nn.log_softmax(z_ref, axis=1)

    assert out.shape == (N, nclass)
    assert jnp.allclose(out, ref, atol=2e-2, rtol=2e-2), "mismatch vs reference"

    print("KERNEL_OK")
</pallas_src>

<mosaic_0001>
module attributes {stable_mosaic.version = 11 : i64} {
  func.func @_project_kernel(%arg0: i32, %arg1: memref<128x128xbf16, #tpu.memory_space<vmem>>, %arg2: memref<128x128xbf16, #tpu.memory_space<vmem>>, %arg3: memref<128x128xbf16, #tpu.memory_space<vmem>>) attributes {dimension_semantics = [#tpu.dimension_semantics<parallel>], iteration_bounds = array<i64: 1>, scalar_prefetch = 0 : i64, scratch_operands = 0 : i64, tpu.core_type = #tpu.core_type<tc>, window_params = [{transform_indices = @transform_0, window_bounds = array<i64: 128, 128>}, {pipeline_mode = #tpu.pipeline_mode<synchronous>, transform_indices = @transform_1, window_bounds = array<i64: 128, 128>}, {transform_indices = @transform_2, window_bounds = array<i64: 128, 128>}]} {
    %c0 = arith.constant 0 : index
    %c0_0 = arith.constant 0 : index
    %0 = vector.load %arg1[%c0, %c0_0] : memref<128x128xbf16, #tpu.memory_space<vmem>>, vector<128x128xbf16>
    %c0_1 = arith.constant 0 : index
    %c0_2 = arith.constant 0 : index
    %1 = vector.load %arg2[%c0_1, %c0_2] : memref<128x128xbf16, #tpu.memory_space<vmem>>, vector<128x128xbf16>
    %cst = arith.constant dense<0.000000e+00> : vector<128x128xf32>
    %2 = tpu.matmul %0, %1, %cst {dimension_numbers = #tpu.dot_dimension_numbers<[1], [0], [0], [1], [0, 0, 1, 1], [], []>} : vector<128x128xbf16>, vector<128x128xbf16>, vector<128x128xf32> -> vector<128x128xf32>
    %3 = arith.truncf %2 : vector<128x128xf32> to vector<128x128xbf16>
    %c0_3 = arith.constant 0 : index
    %c0_4 = arith.constant 0 : index
    %4 = vector.load %arg3[%c0_3, %c0_4] : memref<128x128xbf16, #tpu.memory_space<vmem>>, vector<128x128xbf16>
    tpu.vector_store %arg3[%c0_3, %c0_4], %3 {strides = array<i32>} : memref<128x128xbf16, #tpu.memory_space<vmem>>, vector<128x128xbf16>,
    return
  }
  func.func @transform_0(%arg0: i32) -> (i32, i32) {
    %c0_i32 = arith.constant 0 : i32
    %c0_i32_0 = arith.constant 0 : i32
    return %arg0, %c0_i32 : i32, i32
  }
  func.func @transform_1(%arg0: i32) -> (i32, i32) {
    %c0_i32 = arith.constant 0 : i32
    %c0_i32_0 = arith.constant 0 : i32
    %c0_i32_1 = arith.constant 0 : i32
    return %c0_i32, %c0_i32_0 : i32, i32
  }
  func.func @transform_2(%arg0: i32) -> (i32, i32) {
    %c0_i32 = arith.constant 0 : i32
    %c0_i32_0 = arith.constant 0 : i32
    return %arg0, %c0_i32 : i32, i32
  }
}

module attributes {stable_mosaic.version = 11 : i64} {
  func.func @_aggregate_kernel(%arg0: i32, %arg1: i32, %arg2: memref<128x128xbf16, #tpu.memory_space<vmem>>, %arg3: memref<128x128xbf16, #tpu.memory_space<vmem>>, %arg4: memref<1x128xf32, #tpu.memory_space<vmem>>, %arg5: memref<128x128xbf16, #tpu.memory_space<vmem>>, %arg6: memref<128x128xf32, #tpu.memory_space<vmem>>) attributes {dimension_semantics = [#tpu.dimension_semantics<parallel>, #tpu.dimension_semantics<arbitrary>], iteration_bounds = array<i64: 1, 1>, scalar_prefetch = 0 : i64, scratch_operands = 1 : i64, tpu.core_type = #tpu.core_type<tc>, window_params = [{transform_indices = @transform_0, window_bounds = array<i64: 128, 128>}, {transform_indices = @transform_1, window_bounds = array<i64: 128, 128>}, {pipeline_mode = #tpu.pipeline_mode<synchronous>, transform_indices = @transform_2, window_bounds = array<i64: 1, 128>}, {transform_indices = @transform_3, window_bounds = array<i64: 128, 128>}]} {
    %c0_i32 = arith.constant 0 : i32
    %0 = arith.cmpi eq, %arg1, %c0_i32 : i32
    %1 = arith.extui %0 : i1 to i32
    %c0_i32_0 = arith.constant 0 : i32
    %2 = arith.cmpi ne, %1, %c0_i32_0 : i32
    scf.if %2 {
      %cst_10 = arith.constant 0.000000e+00 : f32
      %12 = vector.broadcast %cst_10 : f32 to vector<128x128xf32>
      %c0_11 = arith.constant 0 : index
      %c0_12 = arith.constant 0 : index
      %13 = vector.load %arg6[%c0_11, %c0_12] : memref<128x128xf32, #tpu.memory_space<vmem>>, vector<128x128xf32>
      tpu.vector_store %arg6[%c0_11, %c0_12], %12 {strides = array<i32>} : memref<128x128xf32, #tpu.memory_space<vmem>>, vector<128x128xf32>,
    } else {
    }
    %c0 = arith.constant 0 : index
    %c0_1 = arith.constant 0 : index
    %3 = vector.load %arg6[%c0, %c0_1] : memref<128x128xf32, #tpu.memory_space<vmem>>, vector<128x128xf32>
    %c0_2 = arith.constant 0 : index
    %c0_3 = arith.constant 0 : index
    %4 = vector.load %arg2[%c0_2, %c0_3] : memref<128x128xbf16, #tpu.memory_space<vmem>>, vector<128x128xbf16>
    %c0_4 = arith.constant 0 : index
    %c0_5 = arith.constant 0 : index
    %5 = vector.load %arg3[%c0_4, %c0_5] : memref<128x128xbf16, #tpu.memory_space<vmem>>, vector<128x128xbf16>
    %cst = arith.constant dense<0.000000e+00> : vector<128x128xf32>
    %6 = tpu.matmul %4, %5, %cst {dimension_numbers = #tpu.dot_dimension_numbers<[1], [0], [0], [1], [0, 0, 1, 1], [], []>} : vector<128x128xbf16>, vector<128x128xbf16>, vector<128x128xf32> -> vector<128x128xf32>
    %7 = arith.addf %3, %6 : vector<128x128xf32>
    %c0_6 = arith.constant 0 : index
    %c0_7 = arith.constant 0 : index
    %8 = vector.load %arg6[%c0_6, %c0_7] : memref<128x128xf32, #tpu.memory_space<vmem>>, vector<128x128xf32>
    tpu.vector_store %arg6[%c0_6, %c0_7], %7 {strides = array<i32>} : memref<128x128xf32, #tpu.memory_space<vmem>>, vector<128x128xf32>,
    %c0_i32_8 = arith.constant 0 : i32
    %9 = arith.cmpi eq, %arg1, %c0_i32_8 : i32
    %10 = arith.extui %9 : i1 to i32
    %c0_i32_9 = arith.constant 0 : i32
    %11 = arith.cmpi ne, %10, %c0_i32_9 : i32
    scf.if %11 {
      %c0_10 = arith.constant 0 : index
      %c0_11 = arith.constant 0 : index
      %12 = vector.load %arg6[%c0_10, %c0_11] : memref<128x128xf32, #tpu.memory_space<vmem>>, vector<128x128xf32>
      %c0_12 = arith.constant 0 : index
      %c0_13 = arith.constant 0 : index
      %13 = vector.load %arg4[%c0_12, %c0_13] : memref<1x128xf32, #tpu.memory_space<vmem>>, vector<1x128xf32>
      %14 = vector.broadcast %13 : vector<1x128xf32> to vector<128x128xf32>
      %15 = arith.addf %12, %14 : vector<128x128xf32>
      %cst_14 = arith.constant 0.000000e+00 : f32
      %16 = vector.broadcast %cst_14 : f32 to vector<128x128xf32>
      %17 = arith.maximumf %15, %16 : vector<128x128xf32>
      %18 = arith.truncf %17 : vector<128x128xf32> to vector<128x128xbf16>
      %c0_15 = arith.constant 0 : index
      %c0_16 = arith.constant 0 : index
      %19 = vector.load %arg5[%c0_15, %c0_16] : memref<128x128xbf16, #tpu.memory_space<vmem>>, vector<128x128xbf16>
      tpu.vector_store %arg5[%c0_15, %c0_16], %18 {strides = array<i32>} : memref<128x128xbf16, #tpu.memory_space<vmem>>, vector<128x128xbf16>,
    } else {
    }
    return
  }
  func.func @transform_0(%arg0: i32, %arg1: i32) -> (i32, i32) {
    %c0_i32 = arith.constant 0 : i32
    return %arg0, %arg1 : i32, i32
  }
  func.func @transform_1(%arg0: i32, %arg1: i32) -> (i32, i32) {
    %c0_i32 = arith.constant 0 : i32
    %c0_i32_0 = arith.constant 0 : i32
    return %arg1, %c0_i32 : i32, i32
  }
  func.func @transform_2(%arg0: i32, %arg1: i32) -> (i32, i32) {
    %c0_i32 = arith.constant 0 : i32
    %c0_i32_0 = arith.constant 0 : i32
    %c0_i32_1 = arith.constant 0 : i32
    return %c0_i32, %c0_i32_0 : i32, i32
  }
  func.func @transform_3(%arg0: i32, %arg1: i32) -> (i32, i32) {
    %c0_i32 = arith.constant 0 : i32
    %c0_i32_0 = arith.constant 0 : i32
    return %arg0, %c0_i32 : i32, i32
  }
}

module attributes {stable_mosaic.version = 11 : i64} {
  func.func @_aggregate_kernel(%arg0: i32, %arg1: i32, %arg2: memref<128x128xbf16, #tpu.memory_space<vmem>>, %arg3: memref<128x128xbf16, #tpu.memory_space<vmem>>, %arg4: memref<1x128xf32, #tpu.memory_space<vmem>>, %arg5: memref<128x128xf32, #tpu.memory_space<vmem>>, %arg6: memref<128x128xf32, #tpu.memory_space<vmem>>) attributes {dimension_semantics = [#tpu.dimension_semantics<parallel>, #tpu.dimension_semantics<arbitrary>], iteration_bounds = array<i64: 1, 1>, scalar_prefetch = 0 : i64, scratch_operands = 1 : i64, tpu.core_type = #tpu.core_type<tc>, window_params = [{transform_indices = @transform_0, window_bounds = array<i64: 128, 128>}, {transform_indices = @transform_1, window_bounds = array<i64: 128, 128>}, {pipeline_mode = #tpu.pipeline_mode<synchronous>, transform_indices = @transform_2, window_bounds = array<i64: 1, 128>}, {transform_indices = @transform_3, window_bounds = array<i64: 128, 128>}]} {
    %c0_i32 = arith.constant 0 : i32
    %0 = arith.cmpi eq, %arg1, %c0_i32 : i32
    %1 = arith.extui %0 : i1 to i32
    %c0_i32_0 = arith.constant 0 : i32
    %2 = arith.cmpi ne, %1, %c0_i32_0 : i32
    scf.if %2 {
      %cst_10 = arith.constant 0.000000e+00 : f32
      %12 = vector.broadcast %cst_10 : f32 to vector<128x128xf32>
      %c0_11 = arith.constant 0 : index
      %c0_12 = arith.constant 0 : index
      %13 = vector.load %arg6[%c0_11, %c0_12] : memref<128x128xf32, #tpu.memory_space<vmem>>, vector<128x128xf32>
      tpu.vector_store %arg6[%c0_11, %c0_12], %12 {strides = array<i32>} : memref<128x128xf32, #tpu.memory_space<vmem>>, vector<128x128xf32>,
    } else {
    }
    %c0 = arith.constant 0 : index
    %c0_1 = arith.constant 0 : index
    %3 = vector.load %arg6[%c0, %c0_1] : memref<128x128xf32, #tpu.memory_space<vmem>>, vector<128x128xf32>
    %c0_2 = arith.constant 0 : index
    %c0_3 = arith.constant 0 : index
    %4 = vector.load %arg2[%c0_2, %c0_3] : memref<128x128xbf16, #tpu.memory_space<vmem>>, vector<128x128xbf16>
    %c0_4 = arith.constant 0 : index
    %c0_5 = arith.constant 0 : index
    %5 = vector.load %arg3[%c0_4, %c0_5] : memref<128x128xbf16, #tpu.memory_space<vmem>>, vector<128x128xbf16>
    %cst = arith.constant dense<0.000000e+00> : vector<128x128xf32>
    %6 = tpu.matmul %4, %5, %cst {dimension_numbers = #tpu.dot_dimension_numbers<[1], [0], [0], [1], [0, 0, 1, 1], [], []>} : vector<128x128xbf16>, vector<128x128xbf16>, vector<128x128xf32> -> vector<128x128xf32>
    %7 = arith.addf %3, %6 : vector<128x128xf32>
    %c0_6 = arith.constant 0 : index
    %c0_7 = arith.constant 0 : index
    %8 = vector.load %arg6[%c0_6, %c0_7] : memref<128x128xf32, #tpu.memory_space<vmem>>, vector<128x128xf32>
    tpu.vector_store %arg6[%c0_6, %c0_7], %7 {strides = array<i32>} : memref<128x128xf32, #tpu.memory_space<vmem>>, vector<128x128xf32>,
    %c0_i32_8 = arith.constant 0 : i32
    %9 = arith.cmpi eq, %arg1, %c0_i32_8 : i32
    %10 = arith.extui %9 : i1 to i32
    %c0_i32_9 = arith.constant 0 : i32
    %11 = arith.cmpi ne, %10, %c0_i32_9 : i32
    scf.if %11 {
      %c0_10 = arith.constant 0 : index
      %c0_11 = arith.constant 0 : index
      %12 = vector.load %arg6[%c0_10, %c0_11] : memref<128x128xf32, #tpu.memory_space<vmem>>, vector<128x128xf32>
      %c0_12 = arith.constant 0 : index
      %c0_13 = arith.constant 0 : index
      %13 = vector.load %arg4[%c0_12, %c0_13] : memref<1x128xf32, #tpu.memory_space<vmem>>, vector<1x128xf32>
      %14 = vector.broadcast %13 : vector<1x128xf32> to vector<128x128xf32>
      %15 = arith.addf %12, %14 : vector<128x128xf32>
      %16 = tpu.iota {dimensions = array<i32: 1>} : vector<128x128xi32>
      %c8_i32 = arith.constant 8 : i32
      %17 = vector.broadcast %c8_i32 : i32 to vector<128x128xi32>
      %18 = arith.cmpi slt, %16, %17 : vector<128x128xi32>
      %cst_14 = arith.constant 0xFF800000 : f32
      %19 = vector.broadcast %cst_14 : f32 to vector<128x128xf32>
      %20 = arith.select %18, %15, %19 : vector<128x128xi1>, vector<128x128xf32>
      %cst_15 = arith.constant dense<0xFF800000> : vector<128xf32>
      %21 = vector.multi_reduction <maximumf>, %20, %cst_15 [1] : vector<128x128xf32> to vector<128xf32>
      %22 = vector.shape_cast %21 : vector<128xf32> to vector<128x1xf32>
      %23 = vector.broadcast %22 : vector<128x1xf32> to vector<128x128xf32>
      %24 = arith.subf %20, %23 : vector<128x128xf32>
      %25 = math.exp %24 : vector<128x128xf32>
      %cst_16 = arith.constant dense<0.000000e+00> : vector<128xf32>
      %26 = vector.multi_reduction <add>, %25, %cst_16 [1] : vector<128x128xf32> to vector<128xf32>
      %27 = vector.shape_cast %26 : vector<128xf32> to vector<128x1xf32>
      %28 = math.log %27 : vector<128x1xf32>
      %29 = vector.broadcast %28 : vector<128x1xf32> to vector<128x128xf32>
      %30 = arith.subf %24, %29 : vector<128x128xf32>
      %c0_17 = arith.constant 0 : index
      %c0_18 = arith.constant 0 : index
      %31 = vector.load %arg5[%c0_17, %c0_18] : memref<128x128xf32, #tpu.memory_space<vmem>>, vector<128x128xf32>
      tpu.vector_store %arg5[%c0_17, %c0_18], %30 {strides = array<i32>} : memref<128x128xf32, #tpu.memory_space<vmem>>, vector<128x128xf32>,
    } else {
    }
    return
  }
  func.func @transform_0(%arg0: i32, %arg1: i32) -> (i32, i32) {
    %c0_i32 = arith.constant 0 : i32
    return %arg0, %arg1 : i32, i32
  }
  func.func @transform_1(%arg0: i32, %arg1: i32) -> (i32, i32) {
    %c0_i32 = arith.constant 0 : i32
    %c0_i32_0 = arith.constant 0 : i32
    return %arg1, %c0_i32 : i32, i32
  }
  func.func @transform_2(%arg0: i32, %arg1: i32) -> (i32, i32) {
    %c0_i32 = arith.constant 0 : i32
    %c0_i32_0 = arith.constant 0 : i32
    %c0_i32_1 = arith.constant 0 : i32
    return %c0_i32, %c0_i32_0 : i32, i32
  }
  func.func @transform_3(%arg0: i32, %arg1: i32) -> (i32, i32) {
    %c0_i32 = arith.constant 0 : i32
    %c0_i32_0 = arith.constant 0 : i32
    return %arg0, %c0_i32 : i32, i32
  }
}

</mosaic_0001>

<bundles_post_ra>
// kernel: gcn_forward.5
= control target key start
LH: loop header
LB: loop body
LE: loop exit
PB: predicated region body
PF: predicated region fallthrough
CT: control target
= control target key end

     0   :  { %8 = vsyncpa [#allocation4], 0  ;;  %s870_s0 = inlined_call_operand.hbm [shape: bf16[128,128], index: 0, kind: input, shape index: {}]   ;;  %s871_s1 = inlined_call_operand.hbm [shape: bf16[128,128], index: 1, kind: input, shape index: {}]   ;;  %s872_s2 = inlined_call_operand.hbm [shape: f32[1,128], index: 2, kind: input, shape index: {}]   ;;  %s873_s3 = inlined_call_operand.hbm [shape: bf16[128,128], index: 3, kind: output, shape index: {}]  }
   0x1   :  { %9 = vsyncpa [#allocation7], 0 }
   0x2   :  { %10 = vsyncpa [#allocation5], 0  ;;  %s780_s12 = smov [#allocation6]   ;;  %s781_s14 = smov [#allocation3]  }
   0x3   :  { %s28_s13 = sshll.u32 %s780_s12, 4  ;;  %s16_s15 = sshll.u32 %s781_s14, 4  ;;  %s29_s13 = int_to_ptr.vmem [resolvable:$true] %s28_s13  ;;  %s806_s15 = int_to_ptr.vmem [resolvable:$true] %s16_s15 }
   0x4   :  { %s686_s18 = scalar_lea.hbm %s871_s1, 1024 }
   0x5   :  { %p687_p0 = scmp.ne.s32.totalorder %s871_s1, %s686_s18  ;;  %p690_p1 = scmp.lt.u32.totalorder %s686_s18, %s871_s1 }
   0x7   :  { %p692_p2 = pnand %p690_p1, %p687_p0 }
   0x9   :  { %695 = shalt.err (!%p692_p2)
}
   0xa   :  { %s696_s23 = scalar_lea.vmem %s29_s13, 1024  ;;  %p701_p4 = scmp.lt.s32.totalorder %s29_s13, %s29_s13 }
   0xb   :  { %p697_p3 = scmp.ne.s32.totalorder %s29_s13, %s696_s23  ;;  %p702_p5 = scmp.lt.s32.totalorder %s696_s23, %s696_s23 }
   0xd   :  { %p703_p6 = por %p702_p5, %p701_p4 }
   0xf   :  { %p704_p7 = pnand %p703_p6, %p697_p3 }
  0x11   :  { %707 = shalt.err (!%p704_p7)
}
  0x12   :  { %s782_s24 = smov 64   ;;  %s783_s25 = smov 4  }
  0x13   :  { %34 = dma.hbm_to_vmem [thread:$0]  %s871_s1, 1024, %s29_s13, [#allocation7], %s782_s24, %s782_s24, %s783_s25  }
  0x14   :  { %s708_s30 = scalar_lea.hbm %s870_s0, 1024 }
  0x15   :  { %p709_p8 = scmp.ne.s32.totalorder %s870_s0, %s708_s30  ;;  %p712_p9 = scmp.lt.u32.totalorder %s708_s30, %s870_s0 }
  0x17   :  { %p714_p10 = pnand %p712_p9, %p709_p8 }
  0x19   :  { %717 = shalt.err (!%p714_p10)
}
  0x1a   :  { %s718_s8 = scalar_lea.vmem %s806_s15, 1024  ;;  %p723_p12 = scmp.lt.s32.totalorder %s806_s15, %s806_s15 }
  0x1b   :  { %p719_p11 = scmp.ne.s32.totalorder %s806_s15, %s718_s8  ;;  %p724_p13 = scmp.lt.s32.totalorder %s718_s8, %s718_s8 }
  0x1d   :  { %p725_p0 = por %p724_p13, %p723_p12 }
  0x1f   :  { %p726_p1 = pnand %p725_p0, %p719_p11 }
  0x21   :  { %729 = shalt.err (!%p726_p1)
}
  0x22   :  { %22 = dma.hbm_to_vmem [thread:$0]  %s870_s0, 1024, %s806_s15, [#allocation4], %s782_s24, %s782_s24, %s783_s25  }
  0x23   :  { %s784_s10 = smov [#allocation8]   ;;  %s730_s14 = scalar_lea.hbm %s872_s2, 16 }
  0x24   :  { %s41_s11 = sshll.u32 %s784_s10, 4  ;;  %p731_p2 = scmp.ne.s32.totalorder %s872_s2, %s730_s14  ;;  %s42_s11 = int_to_ptr.vmem [resolvable:$true] %s41_s11 }
  0x25   :  { %p734_p3 = scmp.lt.u32.totalorder %s730_s14, %s872_s2 }
  0x27   :  { %p736_p4 = pnand %p734_p3, %p731_p2 }
  0x29   :  { %739 = shalt.err (!%p736_p4)
}
  0x2a   :  { %s740_s20 = scalar_lea.vmem %s42_s11, 16  ;;  %s744_s0 = scalar_lea.vmem %s42_s11, 32 }
  0x2b   :  { %p741_p5 = scmp.ne.s32.totalorder %s42_s11, %s740_s20  ;;  %p745_p6 = scmp.lt.s32.totalorder %s42_s11, %s42_s11 }
  0x2c   :  { %p746_p7 = scmp.lt.s32.totalorder %s744_s0, %s740_s20 }
  0x2e   :  { %p747_p8 = por %p746_p7, %p745_p6 }
  0x30   :  { %p748_p9 = pnand %p747_p8, %p741_p5 }
  0x32   :  { %751 = shalt.err (!%p748_p9)
}
  0x33   :  { %44 = dma.hbm_to_vmem [thread:$0]  %s872_s2, 16, %s42_s11, [#allocation7]  }
  0x34   :  { %774 = dma.done.wait [#allocation4], 1024  }
  0x35   :  { %775 = vsyncadd [#allocation4], 4294966272 }
  0x36   :  { %776 = dma.done.wait [#allocation7], 1040  }
  0x37   :  { %777 = vsyncadd [#allocation7], 4294966256  ;;  %v670_v0 = vld [vmem:[#allocation6] sm:$0xff]   ;;  %v671_v1 = vld [vmem:[#allocation6 + $0x8] sm:$0xff]   ;;  %s785_s2 = smov [#allocation9]  }
  0x38   :  { %616 = vmatprep.subr.bf16.mxu0 %v670_v0  ;;  %648 = vmatprep.subr.bf16.mxu1 %v670_v0  ;;  %v672_v2 = vld [vmem:[#allocation6 + $0x10] sm:$0xff]   ;;  %v673_v3 = vld [vmem:[#allocation6 + $0x18] sm:$0xff]   ;;  %v678_v4 = vld [vmem:[#allocation3] sm:$0xff]   ;;  %s491_s22 = sshll.u32 %s785_s2, 4  ;;  %s492_s22 = int_to_ptr.vmem [resolvable:$true] %s491_s22 }
  0x39   :  { %617 = vmatpush3.bf16.msra.mxu0 %v670_v0  ;;  %656 = vmatpush3.bf16.msra.mxu1 %v670_v0  ;;  %v679_v5 = vld [vmem:[#allocation3 + $0x20] sm:$0xff]   ;;  %v675_v7 = vld [vmem:[#allocation6 + $0x28] sm:$0xff]   ;;  %v676_v8 = vld [vmem:[#allocation6 + $0x30] sm:$0xff]   ;;  %s752_s23 = scalar_lea.vmem %s492_s22, 1024  ;;  %p757_p11 = scmp.lt.s32.totalorder %s492_s22, %s492_s22 }
  0x3a   :  { %618 = vmatprep.subr.bf16.mxu0 %v671_v1  ;;  %649 = vmatprep.subr.bf16.mxu1 %v671_v1  ;;  %v674_v6 = vld [vmem:[#allocation6 + $0x20] sm:$0xff]   ;;  %v677_v9 = vld [vmem:[#allocation6 + $0x38] sm:$0xff]   ;;  %v680_v10 = vld [vmem:[#allocation3 + $0x8] sm:$0xff]   ;;  %p753_p10 = scmp.ne.s32.totalorder %s492_s22, %s752_s23  ;;  %p758_p12 = scmp.lt.s32.totalorder %s752_s23, %s752_s23 }
  0x3b   :  { %632 = vmatprep.mubr.bf16.mxu0 %v678_v4  ;;  %640 = vmatprep.mubr.bf16.mxu1 %v679_v5  ;;  %v681_v11 = vld [vmem:[#allocation3 + $0x28] sm:$0xff]   ;;  %v682_v12 = vld [vmem:[#allocation3 + $0x10] sm:$0xff]   ;;  %v684_v14 = vld [vmem:[#allocation3 + $0x18] sm:$0xff]  }
  0x3c   :  { %v683_v13 = vld [vmem:[#allocation3 + $0x30] sm:$0xff]   ;;  %v685_v15 = vld [vmem:[#allocation3 + $0x38] sm:$0xff]   ;;  %v520_v16 = vld [vmem:[#allocation8] ss:$0 sm:$0xff]  ;;  %p759_p13 = por %p758_p12, %p757_p11 }
  0x3d   :  { %619 = vmatpush3.bf16.msra.mxu0 %v671_v1  ;;  %657 = vmatpush3.bf16.msra.mxu1 %v671_v1 }
  0x3e   :  { %620 = vmatprep.subr.bf16.mxu0 %v672_v2  ;;  %650 = vmatprep.subr.bf16.mxu1 %v672_v2  ;;  %p760_p0 = pnand %p759_p13, %p753_p10 }
  0x41   :  { %621 = vmatpush3.bf16.msra.mxu0 %v672_v2  ;;  %658 = vmatpush3.bf16.msra.mxu1 %v672_v2 }
  0x42   :  { %622 = vmatprep.subr.bf16.mxu0 %v673_v3  ;;  %651 = vmatprep.subr.bf16.mxu1 %v673_v3 }
  0x45   :  { %623 = vmatpush3.bf16.msra.mxu0 %v673_v3  ;;  %659 = vmatpush3.bf16.msra.mxu1 %v673_v3 }
  0x46   :  { %624 = vmatprep.subr.bf16.mxu0 %v674_v6  ;;  %652 = vmatprep.subr.bf16.mxu1 %v674_v6 }
  0x49   :  { %625 = vmatpush3.bf16.msra.mxu0 %v674_v6  ;;  %660 = vmatpush3.bf16.msra.mxu1 %v674_v6 }
  0x4a   :  { %626 = vmatprep.subr.bf16.mxu0 %v675_v7  ;;  %653 = vmatprep.subr.bf16.mxu1 %v675_v7 }
  0x4d   :  { %627 = vmatpush3.bf16.msra.mxu0 %v675_v7  ;;  %661 = vmatpush3.bf16.msra.mxu1 %v675_v7 }
  0x4e   :  { %628 = vmatprep.subr.bf16.mxu0 %v676_v8  ;;  %654 = vmatprep.subr.bf16.mxu1 %v676_v8 }
  0x51   :  { %629 = vmatpush3.bf16.msra.mxu0 %v676_v8  ;;  %662 = vmatpush3.bf16.msra.mxu1 %v676_v8 }
  0x52   :  { %630 = vmatprep.subr.bf16.mxu0 %v677_v9  ;;  %655 = vmatprep.subr.bf16.mxu1 %v677_v9 }
  0x55   :  { %631 = vmatpush3.bf16.msra.mxu0 %v677_v9  ;;  %663 = vmatpush3.bf16.msra.mxu1 %v677_v9 }
  0x58   :  { %633 = vmatmul.mubr.bf16.vlgmr.msra.gmra.mrb[0].mxu0 %v680_v10  ;;  %641 = vmatmul.mubr.bf16.vlgmr.msra.gmra.mrb[0].mxu1 %v681_v11 }
  0x59   :  { %636 = vmatprep.mubr.bf16.mxu0 %v682_v12  ;;  %644 = vmatprep.mubr.bf16.mxu1 %v683_v13 }
  0x60   :  { %637 = vmatmul.mubr.bf16.gmra.mrb[4].mxu0 %v684_v14  ;;  %645 = vmatmul.mubr.bf16.gmra.mrb[4].mxu1 %v685_v15 }
 0x12b   :  { %v634_v17 = vpop.f32.mrb[0].mxu0  ;;  %v642_v18 = vpop.f32.mrb[0].mxu1 }
 0x12c   :  { %v376_v19 = vadd.f32 %v634_v17, %v520_v16  ;;  %v384_v20 = vadd.f32 %v642_v18, %v520_v16  ;;  %v253_v21 = vpop.f32.mrb[1].mxu0  ;;  %v285_v22 = vpop.f32.mrb[1].mxu1 }
 0x12d   :  { %v374_v23 = vadd.f32 %v520_v16, %v253_v21  ;;  %v382_v24 = vadd.f32 %v520_v16, %v285_v22  ;;  %v635_v25 = vpop.f32.mrb[2].mxu0  ;;  %v643_v26 = vpop.f32.mrb[2].mxu1 }
 0x12e   :  { %v377_v27 = vadd.f32 %v635_v25, %v520_v16  ;;  %v385_v28 = vadd.f32 %v643_v26, %v520_v16  ;;  %v256_v29 = vpop.f32.mrb[3].mxu0  ;;  %v288_v30 = vpop.f32.mrb[3].mxu1  ;;  %v392_v33 = vmax.f32 %v376_v19, 0.0  ;;  %v400_v34 = vmax.f32 %v384_v20, 0.0 }
 0x12f   :  { %v375_v31 = vadd.f32 %v520_v16, %v256_v29  ;;  %v383_v32 = vadd.f32 %v520_v16, %v288_v30  ;;  %v390_v37 = vmax.f32 %v374_v23, 0.0  ;;  %v398_v38 = vmax.f32 %v382_v24, 0.0 }
 0x130   :  { %v393_v35 = vmax.f32 %v377_v27, 0.0  ;;  %v401_v36 = vmax.f32 %v385_v28, 0.0 }
 0x131   :  { %v391_v39 = vmax.f32 %v375_v31, 0.0  ;;  %v399_v40 = vmax.f32 %v383_v32, 0.0 }
 0x132   :  { %v561_v41 = vpack.c.bf16 %v393_v35, %v392_v33  ;;  %v581_v42 = vpack.c.bf16 %v401_v36, %v400_v34 }
 0x133   :  { %v556_v43 = vpack.c.bf16 %v391_v39, %v390_v37  ;;  %v576_v44 = vpack.c.bf16 %v399_v40, %v398_v38  ;;  %v638_v45 = vpop.f32.mrb[4].mxu0  ;;  %v646_v46 = vpop.f32.mrb[4].mxu1 }
 0x134   :  { %593 = vst [vmem:[#allocation9 + $0x8] sm:$0xff] %v561_v41   ;;  %597 = vst [vmem:[#allocation9 + $0x28] sm:$0xff] %v581_v42   ;;  %v380_v47 = vadd.f32 %v638_v45, %v520_v16  ;;  %v388_v48 = vadd.f32 %v646_v46, %v520_v16  ;;  %v269_v49 = vpop.f32.mrb[5].mxu0  ;;  %v301_v50 = vpop.f32.mrb[5].mxu1 }
 0x135   :  { %557 = vst [vmem:[#allocation9] sm:$0xff] %v556_v43   ;;  %596 = vst [vmem:[#allocation9 + $0x20] sm:$0xff] %v576_v44   ;;  %v378_v51 = vadd.f32 %v520_v16, %v269_v49  ;;  %v386_v52 = vadd.f32 %v520_v16, %v301_v50  ;;  %v639_v53 = vpop.f32.mrb[6].mxu0  ;;  %v647_v54 = vpop.f32.mrb[6].mxu1 }
 0x136   :  { %v381_v55 = vadd.f32 %v639_v53, %v520_v16  ;;  %v389_v56 = vadd.f32 %v647_v54, %v520_v16  ;;  %v272_v57 = vpop.f32.mrb[7].mxu0  ;;  %v304_v58 = vpop.f32.mrb[7].mxu1  ;;  %v396_v61 = vmax.f32 %v380_v47, 0.0  ;;  %v404_v62 = vmax.f32 %v388_v48, 0.0 }
 0x137   :  { %v379_v59 = vadd.f32 %v520_v16, %v272_v57  ;;  %v387_v60 = vadd.f32 %v520_v16, %v304_v58  ;;  %v394_v1 = vmax.f32 %v378_v51, 0.0  ;;  %v402_v2 = vmax.f32 %v386_v52, 0.0 }
 0x138   :  { %v397_v63 = vmax.f32 %v381_v55, 0.0  ;;  %v405_v0 = vmax.f32 %v389_v56, 0.0 }
 0x139   :  { %v395_v3 = vmax.f32 %v379_v59, 0.0  ;;  %v403_v4 = vmax.f32 %v387_v60, 0.0 }
 0x13a   :  { %v571_v5 = vpack.c.bf16 %v397_v63, %v396_v61  ;;  %v591_v6 = vpack.c.bf16 %v405_v0, %v404_v62 }
 0x13b   :  { %v566_v7 = vpack.c.bf16 %v395_v3, %v394_v1  ;;  %v586_v8 = vpack.c.bf16 %v403_v4, %v402_v2 }
 0x13c   :  { %595 = vst [vmem:[#allocation9 + $0x18] sm:$0xff] %v571_v5   ;;  %599 = vst [vmem:[#allocation9 + $0x38] sm:$0xff] %v591_v6  }
 0x13d   :  { %594 = vst [vmem:[#allocation9 + $0x10] sm:$0xff] %v566_v7   ;;  %598 = vst [vmem:[#allocation9 + $0x30] sm:$0xff] %v586_v8  }
 0x13e   :  { %763 = shalt.err (!%p760_p0)
}
 0x13f   :  { %s764_s28 = scalar_lea.hbm %s873_s3, 1024 }
 0x140   :  { %p765_p1 = scmp.ne.s32.totalorder %s873_s3, %s764_s28  ;;  %p768_p2 = scmp.lt.u32.totalorder %s764_s28, %s873_s3 }
 0x142   :  { %p770_p3 = pnand %p768_p2, %p765_p1 }
 0x144   :  { %773 = shalt.err (!%p770_p3)
}
 0x145   :  { %497 = dma.vmem_to_hbm [thread:$0]  %s492_s22, 1024, %s873_s3, [#allocation5], %s782_s24, %s782_s24, %s783_s25  }
 0x146   :  { %778 = dma.done.wait [#allocation5], 1024  }
 0x147   :  { %779 = vsyncadd [#allocation5], 4294966272 }
 0x148   :  { %501 = vsyncpa [#allocation4], 1 }
 0x149   :  { %502 = vsyncpa [#allocation7], 1 }
 0x14a   :  { %503 = vsyncpa [#allocation5], 1 }

// kernel: gcn_forward.7
= control target key start
LH: loop header
LB: loop body
LE: loop exit
PB: predicated region body
PF: predicated region fallthrough
CT: control target
= control target key end

     0   :  { %8 = vsyncpa [#allocation4], 0  ;;  %s1064_s0 = inlined_call_operand.hbm [shape: bf16[128,128], index: 0, kind: input, shape index: {}]   ;;  %s1065_s1 = inlined_call_operand.hbm [shape: bf16[128,128], index: 1, kind: input, shape index: {}]   ;;  %s1066_s2 = inlined_call_operand.hbm [shape: f32[1,128], index: 2, kind: input, shape index: {}]   ;;  %s1067_s3 = inlined_call_operand.hbm [shape: f32[128,128], index: 3, kind: output, shape index: {}]  }
   0x1   :  { %9 = vsyncpa [#allocation7], 0 }
   0x2   :  { %10 = vsyncpa [#allocation5], 0  ;;  %s866_s12 = smov [#allocation6]   ;;  %s867_s14 = smov [#allocation3]  }
   0x3   :  { %s28_s13 = sshll.u32 %s866_s12, 4  ;;  %s16_s15 = sshll.u32 %s867_s14, 4  ;;  %s29_s13 = int_to_ptr.vmem [resolvable:$true] %s28_s13  ;;  %s894_s15 = int_to_ptr.vmem [resolvable:$true] %s16_s15 }
   0x4   :  { %s772_s18 = scalar_lea.hbm %s1065_s1, 1024 }
   0x5   :  { %p773_p0 = scmp.ne.s32.totalorder %s1065_s1, %s772_s18  ;;  %p776_p1 = scmp.lt.u32.totalorder %s772_s18, %s1065_s1 }
   0x7   :  { %p778_p2 = pnand %p776_p1, %p773_p0 }
   0x9   :  { %781 = shalt.err (!%p778_p2)
}
   0xa   :  { %s782_s23 = scalar_lea.vmem %s29_s13, 1024  ;;  %p787_p4 = scmp.lt.s32.totalorder %s29_s13, %s29_s13 }
   0xb   :  { %p783_p3 = scmp.ne.s32.totalorder %s29_s13, %s782_s23  ;;  %p788_p5 = scmp.lt.s32.totalorder %s782_s23, %s782_s23 }
   0xd   :  { %p789_p6 = por %p788_p5, %p787_p4 }
   0xf   :  { %p790_p7 = pnand %p789_p6, %p783_p3 }
  0x11   :  { %793 = shalt.err (!%p790_p7)
}
  0x12   :  { %s868_s24 = smov 64   ;;  %s869_s25 = smov 4  }
  0x13   :  { %34 = dma.hbm_to_vmem [thread:$0]  %s1065_s1, 1024, %s29_s13, [#allocation7], %s868_s24, %s868_s24, %s869_s25  }
  0x14   :  { %s794_s30 = scalar_lea.hbm %s1064_s0, 1024 }
  0x15   :  { %p795_p8 = scmp.ne.s32.totalorder %s1064_s0, %s794_s30  ;;  %p798_p9 = scmp.lt.u32.totalorder %s794_s30, %s1064_s0 }
  0x17   :  { %p800_p10 = pnand %p798_p9, %p795_p8 }
  0x19   :  { %803 = shalt.err (!%p800_p10)
}
  0x1a   :  { %s804_s8 = scalar_lea.vmem %s894_s15, 1024  ;;  %p809_p12 = scmp.lt.s32.totalorder %s894_s15, %s894_s15 }
  0x1b   :  { %p805_p11 = scmp.ne.s32.totalorder %s894_s15, %s804_s8  ;;  %p810_p13 = scmp.lt.s32.totalorder %s804_s8, %s804_s8 }
  0x1d   :  { %p811_p0 = por %p810_p13, %p809_p12 }
  0x1f   :  { %p812_p1 = pnand %p811_p0, %p805_p11 }
  0x21   :  { %815 = shalt.err (!%p812_p1)
}
  0x22   :  { %22 = dma.hbm_to_vmem [thread:$0]  %s1064_s0, 1024, %s894_s15, [#allocation4], %s868_s24, %s868_s24, %s869_s25  }
  0x23   :  { %s870_s10 = smov [#allocation8]   ;;  %s816_s14 = scalar_lea.hbm %s1066_s2, 16 }
  0x24   :  { %s41_s11 = sshll.u32 %s870_s10, 4  ;;  %p817_p2 = scmp.ne.s32.totalorder %s1066_s2, %s816_s14  ;;  %s42_s11 = int_to_ptr.vmem [resolvable:$true] %s41_s11 }
  0x25   :  { %p820_p3 = scmp.lt.u32.totalorder %s816_s14, %s1066_s2 }
  0x27   :  { %p822_p4 = pnand %p820_p3, %p817_p2 }
  0x29   :  { %825 = shalt.err (!%p822_p4)
}
  0x2a   :  { %s826_s20 = scalar_lea.vmem %s42_s11, 16  ;;  %s830_s0 = scalar_lea.vmem %s42_s11, 32 }
  0x2b   :  { %p827_p5 = scmp.ne.s32.totalorder %s42_s11, %s826_s20  ;;  %p831_p6 = scmp.lt.s32.totalorder %s42_s11, %s42_s11 }
  0x2c   :  { %p832_p7 = scmp.lt.s32.totalorder %s830_s0, %s826_s20 }
  0x2e   :  { %p833_p8 = por %p832_p7, %p831_p6 }
  0x30   :  { %p834_p9 = pnand %p833_p8, %p827_p5 }
  0x32   :  { %837 = shalt.err (!%p834_p9)
}
  0x33   :  { %44 = dma.hbm_to_vmem [thread:$0]  %s1066_s2, 16, %s42_s11, [#allocation7]  }
  0x34   :  { %860 = dma.done.wait [#allocation4], 1024  }
  0x35   :  { %861 = vsyncadd [#allocation4], 4294966272 }
  0x36   :  { %862 = dma.done.wait [#allocation7], 1040  }
  0x37   :  { %863 = vsyncadd [#allocation7], 4294966256  ;;  %v692_v0 = vld [vmem:[#allocation6] sm:$0xff]   ;;  %v693_v1 = vld [vmem:[#allocation6 + $0x8] sm:$0xff]   ;;  %v390_v16 = vlaneseq  ;;  %s871_s2 = smov [#allocation9]  }
  0x38   :  { %636 = vmatprep.subr.bf16.mxu0 %v692_v0  ;;  %668 = vmatprep.subr.bf16.mxu1 %v692_v0  ;;  %v694_v2 = vld [vmem:[#allocation6 + $0x10] sm:$0xff]   ;;  %v695_v3 = vld [vmem:[#allocation6 + $0x18] sm:$0xff]   ;;  %v700_v4 = vld [vmem:[#allocation3] sm:$0xff]   ;;  %s590_s22 = sshll.u32 %s871_s2, 4  ;;  %s591_s22 = int_to_ptr.vmem [resolvable:$true] %s590_s22 }
  0x39   :  { %637 = vmatpush3.bf16.msra.mxu0 %v692_v0  ;;  %676 = vmatpush3.bf16.msra.mxu1 %v692_v0  ;;  %v701_v5 = vld [vmem:[#allocation3 + $0x20] sm:$0xff]   ;;  %v697_v7 = vld [vmem:[#allocation6 + $0x28] sm:$0xff]   ;;  %v698_v8 = vld [vmem:[#allocation6 + $0x30] sm:$0xff]   ;;  %v937_v17 = vand.u32 127, %v390_v16  ;;  %s838_s23 = scalar_lea.vmem %s591_s22, 2048  ;;  %p843_p11 = scmp.lt.s32.totalorder %s591_s22, %s591_s22 }
  0x3a   :  { %638 = vmatprep.subr.bf16.mxu0 %v693_v1  ;;  %669 = vmatprep.subr.bf16.mxu1 %v693_v1  ;;  %v696_v6 = vld [vmem:[#allocation6 + $0x20] sm:$0xff]   ;;  %v699_v9 = vld [vmem:[#allocation6 + $0x38] sm:$0xff]   ;;  %v702_v10 = vld [vmem:[#allocation3 + $0x8] sm:$0xff]   ;;  %p839_p10 = scmp.ne.s32.totalorder %s591_s22, %s838_s23  ;;  %p844_p12 = scmp.lt.s32.totalorder %s838_s23, %s838_s23 }
  0x3b   :  { %652 = vmatprep.mubr.bf16.mxu0 %v700_v4  ;;  %660 = vmatprep.mubr.bf16.mxu1 %v701_v5  ;;  %v703_v11 = vld [vmem:[#allocation3 + $0x28] sm:$0xff]   ;;  %v704_v12 = vld [vmem:[#allocation3 + $0x10] sm:$0xff]   ;;  %v705_v14 = vld [vmem:[#allocation3 + $0x18] sm:$0xff]   ;;  %vm392_vm0 = vcmp.lt.s32.totalorder %v937_v17, 8 }
  0x3c   :  { %v706_v13 = vld [vmem:[#allocation3 + $0x30] sm:$0xff]   ;;  %v707_v15 = vld [vmem:[#allocation3 + $0x38] sm:$0xff]   ;;  %v619_v18 = vld [vmem:[#allocation8] ss:$0 sm:$0xff]  ;;  %p845_p13 = por %p844_p12, %p843_p11 }
  0x3d   :  { %639 = vmatpush3.bf16.msra.mxu0 %v693_v1  ;;  %677 = vmatpush3.bf16.msra.mxu1 %v693_v1 }
  0x3e   :  { %640 = vmatprep.subr.bf16.mxu0 %v694_v2  ;;  %670 = vmatprep.subr.bf16.mxu1 %v694_v2  ;;  %p846_p0 = pnand %p845_p13, %p839_p10 }
  0x41   :  { %641 = vmatpush3.bf16.msra.mxu0 %v694_v2  ;;  %678 = vmatpush3.bf16.msra.mxu1 %v694_v2 }
  0x42   :  { %642 = vmatprep.subr.bf16.mxu0 %v695_v3  ;;  %671 = vmatprep.subr.bf16.mxu1 %v695_v3 }
  0x45   :  { %643 = vmatpush3.bf16.msra.mxu0 %v695_v3  ;;  %679 = vmatpush3.bf16.msra.mxu1 %v695_v3 }
  0x46   :  { %644 = vmatprep.subr.bf16.mxu0 %v696_v6  ;;  %672 = vmatprep.subr.bf16.mxu1 %v696_v6 }
  0x49   :  { %645 = vmatpush3.bf16.msra.mxu0 %v696_v6  ;;  %680 = vmatpush3.bf16.msra.mxu1 %v696_v6 }
  0x4a   :  { %646 = vmatprep.subr.bf16.mxu0 %v697_v7  ;;  %673 = vmatprep.subr.bf16.mxu1 %v697_v7 }
  0x4d   :  { %647 = vmatpush3.bf16.msra.mxu0 %v697_v7  ;;  %681 = vmatpush3.bf16.msra.mxu1 %v697_v7 }
  0x4e   :  { %648 = vmatprep.subr.bf16.mxu0 %v698_v8  ;;  %674 = vmatprep.subr.bf16.mxu1 %v698_v8 }
  0x51   :  { %649 = vmatpush3.bf16.msra.mxu0 %v698_v8  ;;  %682 = vmatpush3.bf16.msra.mxu1 %v698_v8 }
  0x52   :  { %650 = vmatprep.subr.bf16.mxu0 %v699_v9  ;;  %675 = vmatprep.subr.bf16.mxu1 %v699_v9 }
  0x55   :  { %651 = vmatpush3.bf16.msra.mxu0 %v699_v9  ;;  %683 = vmatpush3.bf16.msra.mxu1 %v699_v9 }
  0x58   :  { %653 = vmatmul.mubr.bf16.vlgmr.msra.gmra.mrb[0].mxu0 %v702_v10  ;;  %661 = vmatmul.mubr.bf16.vlgmr.msra.gmra.mrb[0].mxu1 %v703_v11 }
  0x59   :  { %656 = vmatprep.mubr.bf16.mxu0 %v704_v12  ;;  %664 = vmatprep.mubr.bf16.mxu1 %v706_v13 }
  0x60   :  { %657 = vmatmul.mubr.bf16.gmra.mrb[4].mxu0 %v705_v14  ;;  %665 = vmatmul.mubr.bf16.gmra.mrb[4].mxu1 %v707_v15 }
 0x12b   :  { %v654_v19 = vpop.f32.mrb[0].mxu0  ;;  %v662_v20 = vpop.f32.mrb[0].mxu1 }
 0x12c   :  { %v376_v21 = vadd.f32 %v654_v19, %v619_v18  ;;  %v384_v22 = vadd.f32 %v662_v20, %v619_v18  ;;  %v253_v23 = vpop.f32.mrb[1].mxu0  ;;  %v285_v24 = vpop.f32.mrb[1].mxu1 }
 0x12d   :  { %v655_v25 = vpop.f32.mrb[2].mxu0  ;;  %v663_v26 = vpop.f32.mrb[2].mxu1  ;;  %v374_v27 = vadd.f32 %v619_v18, %v253_v23  ;;  %v382_v33 = vadd.f32 %v619_v18, %v285_v24 }
 0x12e   :  { %v377_v28 = vadd.f32 %v655_v25, %v619_v18  ;;  %v256_v29 = vpop.f32.mrb[3].mxu0  ;;  %v288_v30 = vpop.f32.mrb[3].mxu1  ;;  %v403_v31 = vsel %vm392_vm0, %v384_v22, -inf  ;;  %v395_v32 = vsel %vm392_vm0, %v376_v21, -inf  ;;  %v385_v34 = vadd.f32 %v663_v26, %v619_v18 }
 0x12f   :  { %429 = vmax.xlane.f32.xlu0 %v403_v31  ;;  %413 = vmax.xlane.f32.xlu1 %v395_v32  ;;  %v393_v35 = vsel %vm392_vm0, %v374_v27, -inf  ;;  %v375_v43 = vadd.f32 %v619_v18, %v256_v29  ;;  %v383_v44 = vadd.f32 %v619_v18, %v288_v30  ;;  %v401_v45 = vsel %vm392_vm0, %v382_v33, -inf }
 0x130   :  { %v396_v36 = vsel %vm392_vm0, %v377_v28, -inf  ;;  %v404_v46 = vsel %vm392_vm0, %v385_v34, -inf }
 0x131   :  { %v402_v51 = vsel %vm392_vm0, %v383_v44, -inf  ;;  %v394_v52 = vsel %vm392_vm0, %v375_v43, -inf }
 0x133   :  { %409 = vmax.xlane.f32.xlu0 %v393_v35  ;;  %415 = vmax.xlane.f32.xlu1 %v396_v36  ;;  %v658_v37 = vpop.f32.mrb[4].mxu0  ;;  %v666_v38 = vpop.f32.mrb[4].mxu1 }
 0x134   :  { %v269_v39 = vpop.f32.mrb[5].mxu0  ;;  %v301_v40 = vpop.f32.mrb[5].mxu1  ;;  %v380_v49 = vadd.f32 %v658_v37, %v619_v18  ;;  %v388_v63 = vadd.f32 %v666_v38, %v619_v18 }
 0x135   :  { %v659_v41 = vpop.f32.mrb[6].mxu0  ;;  %v667_v42 = vpop.f32.mrb[6].mxu1  ;;  %v378_v55 = vadd.f32 %v619_v18, %v269_v39  ;;  %v386_v57 = vadd.f32 %v619_v18, %v301_v40 }
 0x136   :  { %v272_v47 = vpop.f32.mrb[7].mxu0  ;;  %v304_v48 = vpop.f32.mrb[7].mxu1  ;;  %v381_v50 = vadd.f32 %v659_v41, %v619_v18  ;;  %v399_v53 = vsel %vm392_vm0, %v380_v49, -inf  ;;  %v389_v0 = vadd.f32 %v667_v42, %v619_v18  ;;  %v976_v1 = vsel %vm392_vm0, %v388_v63, -inf }
 0x137   :  { %425 = vmax.xlane.f32.xlu0 %v401_v45  ;;  %431 = vmax.xlane.f32.xlu1 %v404_v46  ;;  %v379_v56 = vadd.f32 %v619_v18, %v272_v47  ;;  %v387_v58 = vadd.f32 %v619_v18, %v304_v48  ;;  %v397_v59 = vsel %vm392_vm0, %v378_v55, -inf  ;;  %v966_v61 = vsel %vm392_vm0, %v386_v57, -inf }
 0x138   :  { %v400_v54 = vsel %vm392_vm0, %v381_v50, -inf  ;;  %v980_v2 = vsel %vm392_vm0, %v389_v0, -inf }
 0x139   :  { %v398_v60 = vsel %vm392_vm0, %v379_v56, -inf  ;;  %v970_v62 = vsel %vm392_vm0, %v387_v58, -inf }
 0x13b   :  { %427 = vmax.xlane.f32.xlu1 %v402_v51  ;;  %411 = vmax.xlane.f32.xlu0 %v394_v52 }
 0x13f   :  { %421 = vmax.xlane.f32.xlu0 %v399_v53  ;;  %423 = vmax.xlane.f32.xlu1 %v400_v54 }
 0x143   :  { %417 = vmax.xlane.f32.xlu0 %v397_v59  ;;  %419 = vmax.xlane.f32.xlu1 %v398_v60 }
 0x147   :  { %433 = vmax.xlane.f32.xlu0 %v966_v61  ;;  %435 = vmax.xlane.f32.xlu1 %v970_v62 }
 0x14b   :  { %437 = vmax.xlane.f32.xlu0 %v976_v1  ;;  %439 = vmax.xlane.f32.xlu1 %v980_v2 }
 0x1bc   :  { %v430_v3 = vpop.xlane.xlu0 %429  ;;  %v414_v4 = vpop.xlane.xlu1 %413 }
 0x1bd   :  { %v984_v5 = vsub.f32 %v403_v31, %v430_v3  ;;  %v986_v6 = vsub.f32 %v395_v32, %v414_v4 }
 0x1bf   :  { %v461_v7 = vmul.f32 1.442695, %v986_v6  ;;  %v477_v10 = vmul.f32 1.442695, %v984_v5 }
 0x1c0   :  { %v410_v8 = vpop.xlane.xlu0 %409  ;;  %v416_v9 = vpop.xlane.xlu1 %415 }
 0x1c1   :  { %v990_v11 = vsub.f32 %v393_v35, %v410_v8  ;;  %v992_v12 = vsub.f32 %v396_v36, %v416_v9  ;;  %708 = vpow2.f32 %v461_v7 }
 0x1c2   :  { %710 = vpow2.f32 %v477_v10 }
 0x1c3   :  { %v463_v13 = vmul.f32 1.442695, %v992_v12  ;;  %v457_v16 = vmul.f32 1.442695, %v990_v11 }
 0x1c4   :  { %v426_v14 = vpop.xlane.xlu0 %425  ;;  %v432_v15 = vpop.xlane.xlu1 %431 }
 0x1c5   :  { %v996_v17 = vsub.f32 %v401_v45, %v426_v14  ;;  %v998_v18 = vsub.f32 %v404_v46, %v432_v15  ;;  %712 = vpow2.f32 %v463_v13 }
 0x1c6   :  { %714 = vpow2.f32 %v457_v16 }
 0x1c7   :  { %v479_v19 = vmul.f32 1.442695, %v998_v18  ;;  %v473_v22 = vmul.f32 1.442695, %v996_v17 }
 0x1c8   :  { %v428_v20 = vpop.xlane.xlu1 %427  ;;  %v412_v21 = vpop.xlane.xlu0 %411 }
 0x1c9   :  { %v1002_v23 = vsub.f32 %v394_v52, %v412_v21  ;;  %716 = vpow2.f32 %v479_v19  ;;  %v1004_v24 = vsub.f32 %v402_v51, %v428_v20 }
 0x1ca   :  { %718 = vpow2.f32 %v473_v22 }
 0x1cb   :  { %v459_v25 = vmul.f32 1.442695, %v1002_v23  ;;  %v709_v26 = vpop.eup %708  ;;  %v475_v30 = vmul.f32 1.442695, %v1004_v24 }
 0x1cc   :  { %v422_v27 = vpop.xlane.xlu0 %421  ;;  %v424_v28 = vpop.xlane.xlu1 %423  ;;  %493 = vadd.xlane.f32.xlu0 %v709_v26 }
 0x1cd   :  { %v1007_v29 = vsub.f32 %v399_v53, %v422_v27  ;;  %720 = vpow2.f32 %v459_v25  ;;  %v1010_v31 = vsub.f32 %v400_v54, %v424_v28  ;;  %v711_v32 = vpop.eup %710 }
 0x1cf   :  { %v469_v33 = vmul.f32 1.442695, %v1007_v29  ;;  %v713_v34 = vpop.eup %712  ;;  %v471_v38 = vmul.f32 1.442695, %v1010_v31 }
 0x1d0   :  { %v418_v35 = vpop.xlane.xlu0 %417  ;;  %v420_v36 = vpop.xlane.xlu1 %419  ;;  %509 = vadd.xlane.f32.xlu0 %v711_v32  ;;  %495 = vadd.xlane.f32.xlu1 %v713_v34 }
 0x1d1   :  { %722 = vpow2.f32 %v469_v33  ;;  %v1013_v37 = vsub.f32 %v397_v59, %v418_v35  ;;  %v1016_v39 = vsub.f32 %v398_v60, %v420_v36  ;;  %v715_v40 = vpop.eup %714 }
 0x1d2   :  { %724 = vpow2.f32 %v475_v30 }
 0x1d3   :  { %v465_v41 = vmul.f32 1.442695, %v1013_v37  ;;  %v717_v42 = vpop.eup %716  ;;  %v467_v46 = vmul.f32 1.442695, %v1016_v39 }
 0x1d4   :  { %v434_v43 = vpop.xlane.xlu0 %433  ;;  %v436_v44 = vpop.xlane.xlu1 %435  ;;  %489 = vadd.xlane.f32.xlu0 %v715_v40  ;;  %511 = vadd.xlane.f32.xlu1 %v717_v42 }
 0x1d5   :  { %726 = vpow2.f32 %v465_v41  ;;  %v1020_v45 = vsub.f32 %v966_v61, %v434_v43  ;;  %v1024_v47 = vsub.f32 %v970_v62, %v436_v44  ;;  %v719_v48 = vpop.eup %718 }
 0x1d6   :  { %728 = vpow2.f32 %v471_v38 }
 0x1d7   :  { %v481_v49 = vmul.f32 1.442695, %v1020_v45  ;;  %v721_v50 = vpop.eup %720  ;;  %v483_v54 = vmul.f32 1.442695, %v1024_v47 }
 0x1d8   :  { %v438_v51 = vpop.xlane.xlu0 %437  ;;  %v440_v52 = vpop.xlane.xlu1 %439  ;;  %505 = vadd.xlane.f32.xlu0 %v719_v48  ;;  %491 = vadd.xlane.f32.xlu1 %v721_v50 }
 0x1d9   :  { %730 = vpow2.f32 %v481_v49  ;;  %v1028_v53 = vsub.f32 %v976_v1, %v438_v51  ;;  %v1032_v55 = vsub.f32 %v980_v2, %v440_v52 }
 0x1da   :  { %732 = vpow2.f32 %v467_v46 }
 0x1db   :  { %v723_v56 = vpop.eup %722  ;;  %v485_v57 = vmul.f32 1.442695, %v1028_v53  ;;  %v487_v59 = vmul.f32 1.442695, %v1032_v55 }
 0x1dc   :  { %v725_v58 = vpop.eup %724  ;;  %501 = vadd.xlane.f32.xlu0 %v723_v56 }
 0x1dd   :  { %734 = vpow2.f32 %v485_v57  ;;  %507 = vadd.xlane.f32.xlu1 %v725_v58 }
 0x1de   :  { %736 = vpow2.f32 %v483_v54 }
 0x1df   :  { %v727_v60 = vpop.eup %726  ;;  %738 = vpow2.f32 %v487_v59 }
 0x1e0   :  { %v729_v61 = vpop.eup %728  ;;  %497 = vadd.xlane.f32.xlu0 %v727_v60 }
 0x1e1   :  { %503 = vadd.xlane.f32.xlu1 %v729_v61 }
 0x1e3   :  { %v731_v62 = vpop.eup %730 }
 0x1e4   :  { %v733_v63 = vpop.eup %732  ;;  %513 = vadd.xlane.f32.xlu0 %v731_v62 }
 0x1e5   :  { %499 = vadd.xlane.f32.xlu1 %v733_v63 }
 0x1e7   :  { %v735_v0 = vpop.eup %734 }
 0x1e8   :  { %v737_v1 = vpop.eup %736  ;;  %517 = vadd.xlane.f32.xlu0 %v735_v0 }
 0x1e9   :  { %515 = vadd.xlane.f32.xlu1 %v737_v1  ;;  %v739_v2 = vpop.eup %738 }
 0x1ed   :  { %519 = vadd.xlane.f32.xlu1 %v739_v2 }
 0x259   :  { %v494_v3 = vpop.xlane.xlu0 %493 }
 0x25a   :  { %740 = vlog2.f32 %v494_v3 }
 0x25d   :  { %v510_v4 = vpop.xlane.xlu0 %509  ;;  %v496_v7 = vpop.xlane.xlu1 %495 }
 0x25e   :  { %742 = vlog2.f32 %v510_v4 }
 0x25f   :  { %744 = vlog2.f32 %v496_v7 }
 0x261   :  { %v490_v8 = vpop.xlane.xlu0 %489  ;;  %v512_v9 = vpop.xlane.xlu1 %511 }
 0x262   :  { %746 = vlog2.f32 %v490_v8 }
 0x263   :  { %748 = vlog2.f32 %v512_v9 }
 0x264   :  { %v741_v10 = vpop.eup %740 }
 0x265   :  { %v526_v13 = vmul.f32 0.6931472, %v741_v10  ;;  %v506_v14 = vpop.xlane.xlu0 %505  ;;  %v492_v15 = vpop.xlane.xlu1 %491 }
 0x266   :  { %750 = vlog2.f32 %v506_v14 }
 0x267   :  { %v555_v16 = vsub.f32 %v986_v6, %v526_v13  ;;  %752 = vlog2.f32 %v492_v15 }
 0x268   :  { %v743_v19 = vpop.eup %742 }
 0x269   :  { %v745_v20 = vpop.eup %744  ;;  %571 = vst [vmem:[#allocation9 + $0x10] sm:$0xff] %v555_v16  ;;  %v542_v21 = vmul.f32 0.6931472, %v743_v19  ;;  %v502_v22 = vpop.xlane.xlu0 %501 }
 0x26a   :  { %v508_v25 = vpop.xlane.xlu1 %507  ;;  %v528_v26 = vmul.f32 0.6931472, %v745_v20  ;;  %754 = vlog2.f32 %v502_v22 }
 0x26b   :  { %v563_v27 = vsub.f32 %v984_v5, %v542_v21  ;;  %756 = vlog2.f32 %v508_v25 }
 0x26c   :  { %v747_v28 = vpop.eup %746  ;;  %v556_v30 = vsub.f32 %v992_v12, %v528_v26 }
 0x26d   :  { %v749_v32 = vpop.eup %748  ;;  %579 = vst [vmem:[#allocation9 + $0x50] sm:$0xff] %v563_v27  ;;  %v522_v33 = vmul.f32 0.6931472, %v747_v28  ;;  %v498_v34 = vpop.xlane.xlu0 %497 }
 0x26e   :  { %v504_v6 = vpop.xlane.xlu1 %503  ;;  %572 = vst [vmem:[#allocation9 + $0x18] sm:$0xff] %v556_v30  ;;  %v544_v35 = vmul.f32 0.6931472, %v749_v32  ;;  %758 = vlog2.f32 %v498_v34 }
 0x26f   :  { %v553_v36 = vsub.f32 %v990_v11, %v522_v33  ;;  %760 = vlog2.f32 %v504_v6 }
 0x270   :  { %v751_v38 = vpop.eup %750  ;;  %v564_v40 = vsub.f32 %v998_v18, %v544_v35 }
 0x271   :  { %v753_v41 = vpop.eup %752  ;;  %569 = vst [vmem:[#allocation9] sm:$0xff] %v553_v36  ;;  %v538_v5 = vmul.f32 0.6931472, %v751_v38  ;;  %v514_v42 = vpop.xlane.xlu0 %513 }
 0x272   :  { %v500_v43 = vpop.xlane.xlu1 %499  ;;  %580 = vst [vmem:[#allocation9 + $0x58] sm:$0xff] %v564_v40  ;;  %v524_v12 = vmul.f32 0.6931472, %v753_v41  ;;  %762 = vlog2.f32 %v514_v42 }
 0x273   :  { %v561_v44 = vsub.f32 %v996_v17, %v538_v5  ;;  %764 = vlog2.f32 %v500_v43 }
 0x274   :  { %v755_v46 = vpop.eup %754  ;;  %v554_v48 = vsub.f32 %v1002_v23, %v524_v12 }
 0x275   :  { %v757_v49 = vpop.eup %756  ;;  %577 = vst [vmem:[#allocation9 + $0x40] sm:$0xff] %v561_v44  ;;  %v534_v11 = vmul.f32 0.6931472, %v755_v46  ;;  %v518_v50 = vpop.xlane.xlu0 %517 }
 0x276   :  { %v516_v51 = vpop.xlane.xlu1 %515  ;;  %570 = vst [vmem:[#allocation9 + $0x8] sm:$0xff] %v554_v48  ;;  %v540_v18 = vmul.f32 0.6931472, %v757_v49  ;;  %766 = vlog2.f32 %v518_v50 }
 0x277   :  { %v559_v52 = vsub.f32 %v1007_v29, %v534_v11  ;;  %768 = vlog2.f32 %v516_v51 }
 0x278   :  { %v759_v54 = vpop.eup %758  ;;  %v562_v56 = vsub.f32 %v1004_v24, %v540_v18 }
 0x279   :  { %v761_v57 = vpop.eup %760  ;;  %575 = vst [vmem:[#allocation9 + $0x30] sm:$0xff] %v559_v52  ;;  %v530_v17 = vmul.f32 0.6931472, %v759_v54 }
 0x27a   :  { %v520_v58 = vpop.xlane.xlu1 %519  ;;  %578 = vst [vmem:[#allocation9 + $0x48] sm:$0xff] %v562_v56  ;;  %v536_v23 = vmul.f32 0.6931472, %v761_v57 }
 0x27b   :  { %770 = vlog2.f32 %v520_v58  ;;  %v557_v59 = vsub.f32 %v1013_v37, %v530_v17 }
 0x27c   :  { %v763_v60 = vpop.eup %762  ;;  %v560_v61 = vsub.f32 %v1010_v31, %v536_v23 }
 0x27d   :  { %v765_v62 = vpop.eup %764  ;;  %573 = vst [vmem:[#allocation9 + $0x20] sm:$0xff] %v557_v59  ;;  %v546_v63 = vmul.f32 0.6931472, %v763_v60 }
 0x27e   :  { %576 = vst [vmem:[#allocation9 + $0x38] sm:$0xff] %v560_v61  ;;  %v532_v29 = vmul.f32 0.6931472, %v765_v62 }
 0x27f   :  { %v565_v0 = vsub.f32 %v1020_v45, %v546_v63 }
 0x280   :  { %v767_v24 = vpop.eup %766  ;;  %v558_v1 = vsub.f32 %v1016_v39, %v532_v29 }
 0x281   :  { %v769_v2 = vpop.eup %768  ;;  %581 = vst [vmem:[#allocation9 + $0x60] sm:$0xff] %v565_v0  ;;  %v550_v3 = vmul.f32 0.6931472, %v767_v24 }
 0x282   :  { %574 = vst [vmem:[#allocation9 + $0x28] sm:$0xff] %v558_v1  ;;  %v548_v4 = vmul.f32 0.6931472, %v769_v2 }
 0x283   :  { %v567_v37 = vsub.f32 %v1028_v53, %v550_v3 }
 0x284   :  { %v566_v31 = vsub.f32 %v1024_v47, %v548_v4 }
 0x285   :  { %v771_v7 = vpop.eup %770  ;;  %583 = vst [vmem:[#allocation9 + $0x70] sm:$0xff] %v567_v37 }
 0x286   :  { %v552_v8 = vmul.f32 0.6931472, %v771_v7  ;;  %582 = vst [vmem:[#allocation9 + $0x68] sm:$0xff] %v566_v31 }
 0x288   :  { %v568_v45 = vsub.f32 %v1032_v55, %v552_v8 }
 0x28a   :  { %584 = vst [vmem:[#allocation9 + $0x78] sm:$0xff] %v568_v45 }
 0x28b   :  { %849 = shalt.err (!%p846_p0)
}
 0x28c   :  { %s850_s26 = scalar_lea.hbm %s1067_s3, 2048 }
 0x28d   :  { %p851_p1 = scmp.ne.s32.totalorder %s1067_s3, %s850_s26  ;;  %p854_p2 = scmp.lt.u32.totalorder %s850_s26, %s1067_s3 }
 0x28f   :  { %p856_p3 = pnand %p854_p2, %p851_p1 }
 0x291   :  { %859 = shalt.err (!%p856_p3)
}
 0x292   :  { %s872_s4 = smov 128   ;;  %s873_s5 = smov 8  }
 0x293   :  { %596 = dma.vmem_to_hbm [thread:$0]  %s591_s22, 2048, %s1067_s3, [#allocation5], %s872_s4, %s872_s4, %s873_s5  }
 0x294   :  { %864 = dma.done.wait [#allocation5], 2048  }
 0x295   :  { %865 = vsyncadd [#allocation5], 4294965248 }
 0x296   :  { %600 = vsyncpa [#allocation4], 1 }
 0x297   :  { %601 = vsyncpa [#allocation7], 1 }
 0x298   :  { %602 = vsyncpa [#allocation5], 1 }

// kernel: gcn_forward.4
= control target key start
LH: loop header
LB: loop body
LE: loop exit
PB: predicated region body
PF: predicated region fallthrough
CT: control target
= control target key end

     0   :  { %7 = vsyncpa [#allocation3], 0  ;;  %s681_s0 = inlined_call_operand.hbm [shape: bf16[128,128], index: 0, kind: input, shape index: {}]   ;;  %s682_s1 = inlined_call_operand.hbm [shape: bf16[128,128], index: 1, kind: input, shape index: {}]   ;;  %s683_s2 = inlined_call_operand.hbm [shape: bf16[128,128], index: 2, kind: output, shape index: {}]  }
   0x1   :  { %8 = vsyncpa [#allocation6], 0 }
   0x2   :  { %9 = vsyncpa [#allocation4], 0  ;;  %s616_s9 = smov [#allocation2]   ;;  %s544_s13 = scalar_lea.hbm %s681_s0, 1024 }
   0x3   :  { %s15_s10 = sshll.u32 %s616_s9, 4  ;;  %p545_p0 = scmp.ne.s32.totalorder %s681_s0, %s544_s13  ;;  %s16_s10 = int_to_ptr.vmem [resolvable:$true] %s15_s10 }
   0x4   :  { %p548_p1 = scmp.lt.u32.totalorder %s544_s13, %s681_s0 }
   0x6   :  { %p550_p2 = pnand %p548_p1, %p545_p0 }
   0x8   :  { %553 = shalt.err (!%p550_p2)
}
   0x9   :  { %s554_s18 = scalar_lea.vmem %s16_s10, 1024  ;;  %p559_p4 = scmp.lt.s32.totalorder %s16_s10, %s16_s10 }
   0xa   :  { %p555_p3 = scmp.ne.s32.totalorder %s16_s10, %s554_s18  ;;  %p560_p5 = scmp.lt.s32.totalorder %s554_s18, %s554_s18 }
   0xc   :  { %p561_p6 = por %p560_p5, %p559_p4 }
   0xe   :  { %p562_p7 = pnand %p561_p6, %p555_p3 }
  0x10   :  { %565 = shalt.err (!%p562_p7)
}
  0x11   :  { %s617_s19 = smov 64   ;;  %s618_s20 = smov 4  }
  0x12   :  { %21 = dma.hbm_to_vmem [thread:$0]  %s681_s0, 1024, %s16_s10, [#allocation3], %s617_s19, %s617_s19, %s618_s20  }
  0x13   :  { %s619_s23 = smov [#allocation5]   ;;  %s566_s27 = scalar_lea.hbm %s682_s1, 1024 }
  0x14   :  { %s27_s24 = sshll.u32 %s619_s23, 4  ;;  %p567_p8 = scmp.ne.s32.totalorder %s682_s1, %s566_s27  ;;  %s28_s24 = int_to_ptr.vmem [resolvable:$true] %s27_s24 }
  0x15   :  { %p570_p9 = scmp.lt.u32.totalorder %s566_s27, %s682_s1 }
  0x17   :  { %p572_p10 = pnand %p570_p9, %p567_p8 }
  0x19   :  { %575 = shalt.err (!%p572_p10)
}
  0x1a   :  { %s576_s4 = scalar_lea.vmem %s28_s24, 1024  ;;  %p581_p12 = scmp.lt.s32.totalorder %s28_s24, %s28_s24 }
  0x1b   :  { %p577_p11 = scmp.ne.s32.totalorder %s28_s24, %s576_s4  ;;  %p582_p13 = scmp.lt.s32.totalorder %s576_s4, %s576_s4 }
  0x1d   :  { %p583_p0 = por %p582_p13, %p581_p12 }
  0x1f   :  { %p584_p1 = pnand %p583_p0, %p577_p11 }
  0x21   :  { %587 = shalt.err (!%p584_p1)
}
  0x22   :  { %33 = dma.hbm_to_vmem [thread:$0]  %s682_s1, 1024, %s28_s24, [#allocation6], %s617_s19, %s617_s19, %s618_s20  }
  0x23   :  { %610 = dma.done.wait [#allocation3], 1024  }
  0x24   :  { %611 = vsyncadd [#allocation3], 4294966272 }
  0x25   :  { %612 = dma.done.wait [#allocation6], 1024  }
  0x26   :  { %613 = vsyncadd [#allocation6], 4294966272  ;;  %v528_v0 = vld [vmem:[#allocation5] sm:$0xff]   ;;  %v529_v1 = vld [vmem:[#allocation5 + $0x8] sm:$0xff]   ;;  %s620_s1 = smov [#allocation7]  }
  0x27   :  { %475 = vmatprep.subr.bf16.mxu0 %v528_v0  ;;  %507 = vmatprep.subr.bf16.mxu1 %v528_v0  ;;  %v530_v2 = vld [vmem:[#allocation5 + $0x10] sm:$0xff]   ;;  %v531_v3 = vld [vmem:[#allocation5 + $0x18] sm:$0xff]   ;;  %v536_v4 = vld [vmem:[#allocation2] sm:$0xff]   ;;  %s351_s6 = sshll.u32 %s620_s1, 4  ;;  %s352_s6 = int_to_ptr.vmem [resolvable:$true] %s351_s6 }
  0x28   :  { %476 = vmatpush3.bf16.msra.mxu0 %v528_v0  ;;  %515 = vmatpush3.bf16.msra.mxu1 %v528_v0  ;;  %v537_v5 = vld [vmem:[#allocation2 + $0x20] sm:$0xff]   ;;  %v533_v7 = vld [vmem:[#allocation5 + $0x28] sm:$0xff]   ;;  %v534_v8 = vld [vmem:[#allocation5 + $0x30] sm:$0xff]   ;;  %s588_s7 = scalar_lea.vmem %s352_s6, 1024  ;;  %p593_p3 = scmp.lt.s32.totalorder %s352_s6, %s352_s6 }
  0x29   :  { %477 = vmatprep.subr.bf16.mxu0 %v529_v1  ;;  %508 = vmatprep.subr.bf16.mxu1 %v529_v1  ;;  %v532_v6 = vld [vmem:[#allocation5 + $0x20] sm:$0xff]   ;;  %v535_v9 = vld [vmem:[#allocation5 + $0x38] sm:$0xff]   ;;  %v538_v10 = vld [vmem:[#allocation2 + $0x8] sm:$0xff]   ;;  %p589_p2 = scmp.ne.s32.totalorder %s352_s6, %s588_s7  ;;  %p594_p4 = scmp.lt.s32.totalorder %s588_s7, %s588_s7 }
  0x2a   :  { %491 = vmatprep.mubr.bf16.mxu0 %v536_v4  ;;  %499 = vmatprep.mubr.bf16.mxu1 %v537_v5  ;;  %v539_v11 = vld [vmem:[#allocation2 + $0x28] sm:$0xff]   ;;  %v540_v12 = vld [vmem:[#allocation2 + $0x10] sm:$0xff]   ;;  %v542_v14 = vld [vmem:[#allocation2 + $0x18] sm:$0xff]  }
  0x2b   :  { %v541_v13 = vld [vmem:[#allocation2 + $0x30] sm:$0xff]   ;;  %v543_v15 = vld [vmem:[#allocation2 + $0x38] sm:$0xff]   ;;  %p595_p5 = por %p594_p4, %p593_p3 }
  0x2c   :  { %478 = vmatpush3.bf16.msra.mxu0 %v529_v1  ;;  %516 = vmatpush3.bf16.msra.mxu1 %v529_v1 }
  0x2d   :  { %479 = vmatprep.subr.bf16.mxu0 %v530_v2  ;;  %509 = vmatprep.subr.bf16.mxu1 %v530_v2  ;;  %p596_p6 = pnand %p595_p5, %p589_p2 }
  0x30   :  { %480 = vmatpush3.bf16.msra.mxu0 %v530_v2  ;;  %517 = vmatpush3.bf16.msra.mxu1 %v530_v2 }
  0x31   :  { %481 = vmatprep.subr.bf16.mxu0 %v531_v3  ;;  %510 = vmatprep.subr.bf16.mxu1 %v531_v3 }
  0x34   :  { %482 = vmatpush3.bf16.msra.mxu0 %v531_v3  ;;  %518 = vmatpush3.bf16.msra.mxu1 %v531_v3 }
  0x35   :  { %483 = vmatprep.subr.bf16.mxu0 %v532_v6  ;;  %511 = vmatprep.subr.bf16.mxu1 %v532_v6 }
  0x38   :  { %484 = vmatpush3.bf16.msra.mxu0 %v532_v6  ;;  %519 = vmatpush3.bf16.msra.mxu1 %v532_v6 }
  0x39   :  { %485 = vmatprep.subr.bf16.mxu0 %v533_v7  ;;  %512 = vmatprep.subr.bf16.mxu1 %v533_v7 }
  0x3c   :  { %486 = vmatpush3.bf16.msra.mxu0 %v533_v7  ;;  %520 = vmatpush3.bf16.msra.mxu1 %v533_v7 }
  0x3d   :  { %487 = vmatprep.subr.bf16.mxu0 %v534_v8  ;;  %513 = vmatprep.subr.bf16.mxu1 %v534_v8 }
  0x40   :  { %488 = vmatpush3.bf16.msra.mxu0 %v534_v8  ;;  %521 = vmatpush3.bf16.msra.mxu1 %v534_v8 }
  0x41   :  { %489 = vmatprep.subr.bf16.mxu0 %v535_v9  ;;  %514 = vmatprep.subr.bf16.mxu1 %v535_v9 }
  0x44   :  { %490 = vmatpush3.bf16.msra.mxu0 %v535_v9  ;;  %522 = vmatpush3.bf16.msra.mxu1 %v535_v9 }
  0x47   :  { %492 = vmatmul.mubr.bf16.vlgmr.msra.gmra.mrb[0].mxu0 %v538_v10  ;;  %500 = vmatmul.mubr.bf16.vlgmr.msra.gmra.mrb[0].mxu1 %v539_v11 }
  0x48   :  { %495 = vmatprep.mubr.bf16.mxu0 %v540_v12  ;;  %503 = vmatprep.mubr.bf16.mxu1 %v541_v13 }
  0x4f   :  { %496 = vmatmul.mubr.bf16.gmra.mrb[4].mxu0 %v542_v14  ;;  %504 = vmatmul.mubr.bf16.gmra.mrb[4].mxu1 %v543_v15 }
 0x11a   :  { %v493_v16 = vpop.f32.mrb[0].mxu0  ;;  %v501_v17 = vpop.f32.mrb[0].mxu1 }
 0x11b   :  { %v203_v18 = vpop.f32.mrb[1].mxu0  ;;  %v235_v19 = vpop.f32.mrb[1].mxu1 }
 0x11c   :  { %v494_v20 = vpop.f32.mrb[2].mxu0  ;;  %v502_v21 = vpop.f32.mrb[2].mxu1 }
 0x11d   :  { %v420_v22 = vpack.c.bf16 %v494_v20, %v493_v16  ;;  %v440_v23 = vpack.c.bf16 %v502_v21, %v501_v17  ;;  %v206_v24 = vpop.f32.mrb[3].mxu0  ;;  %v238_v25 = vpop.f32.mrb[3].mxu1 }
 0x11e   :  { %v415_v26 = vpack.c.bf16 %v206_v24, %v203_v18  ;;  %v435_v27 = vpack.c.bf16 %v238_v25, %v235_v19 }
 0x11f   :  { %452 = vst [vmem:[#allocation7 + $0x8] sm:$0xff] %v420_v22   ;;  %456 = vst [vmem:[#allocation7 + $0x28] sm:$0xff] %v440_v23  }
 0x120   :  { %416 = vst [vmem:[#allocation7] sm:$0xff] %v415_v26   ;;  %455 = vst [vmem:[#allocation7 + $0x20] sm:$0xff] %v435_v27  }
 0x122   :  { %v497_v28 = vpop.f32.mrb[4].mxu0  ;;  %v505_v29 = vpop.f32.mrb[4].mxu1 }
 0x123   :  { %v219_v30 = vpop.f32.mrb[5].mxu0  ;;  %v251_v31 = vpop.f32.mrb[5].mxu1 }
 0x124   :  { %v498_v32 = vpop.f32.mrb[6].mxu0  ;;  %v506_v33 = vpop.f32.mrb[6].mxu1 }
 0x125   :  { %v430_v34 = vpack.c.bf16 %v498_v32, %v497_v28  ;;  %v450_v35 = vpack.c.bf16 %v506_v33, %v505_v29  ;;  %v222_v36 = vpop.f32.mrb[7].mxu0  ;;  %v254_v37 = vpop.f32.mrb[7].mxu1 }
 0x126   :  { %v425_v38 = vpack.c.bf16 %v222_v36, %v219_v30  ;;  %v445_v39 = vpack.c.bf16 %v254_v37, %v251_v31 }
 0x127   :  { %454 = vst [vmem:[#allocation7 + $0x18] sm:$0xff] %v430_v34   ;;  %458 = vst [vmem:[#allocation7 + $0x38] sm:$0xff] %v450_v35  }
 0x128   :  { %453 = vst [vmem:[#allocation7 + $0x10] sm:$0xff] %v425_v38   ;;  %457 = vst [vmem:[#allocation7 + $0x30] sm:$0xff] %v445_v39  }
 0x129   :  { %599 = shalt.err (!%p596_p6)
}
 0x12a   :  { %s600_s10 = scalar_lea.hbm %s683_s2, 1024 }
 0x12b   :  { %p601_p7 = scmp.ne.s32.totalorder %s683_s2, %s600_s10  ;;  %p604_p8 = scmp.lt.u32.totalorder %s600_s10, %s683_s2 }
 0x12d   :  { %p606_p9 = pnand %p604_p8, %p601_p7 }
 0x12f   :  { %609 = shalt.err (!%p606_p9)
}
 0x130   :  { %357 = dma.vmem_to_hbm [thread:$0]  %s352_s6, 1024, %s683_s2, [#allocation4], %s617_s19, %s617_s19, %s618_s20  }
 0x131   :  { %614 = dma.done.wait [#allocation4], 1024  }
 0x132   :  { %615 = vsyncadd [#allocation4], 4294966272 }
 0x133   :  { %361 = vsyncpa [#allocation3], 1 }
 0x134   :  { %362 = vsyncpa [#allocation6], 1 }
 0x135   :  { %363 = vsyncpa [#allocation4], 1 }

</bundles_post_ra>
